<compile_context>
chip_gen: v5e
topology: v5e:2x2
jax: 0.10.0
libtpu: 0.0.40
codegen_flags: <defaults>
</compile_context>

<pallas_src>
import functools

import jax
import jax.numpy as jnp
from jax import lax
from jax.experimental import pallas as pl
from jax.experimental.pallas import tpu as pltpu


def _mha_kernel(q_ref, k_ref, v_ref,
                wq_ref, bq_ref, wk_ref, bk_ref, wv_ref, bv_ref,
                wo_ref, bo_ref, out_ref,
                *, batch, seq, num_heads, depth, scale):
    nhb = num_heads * batch           # fused (head, batch) leading dim
    h2 = num_heads * depth

    def project(x_ref, w_ref, b_ref):
        # Replicate the (B, S, H) activations across heads -> (nh*B, S, H).
        # Leading-dim broadcast + leading-dim merge only (no lane relayout).
        x = jnp.broadcast_to(x_ref[...][None],
                             (num_heads, batch, seq, x_ref.shape[-1]))
        x = x.reshape(nhb, seq, x_ref.shape[-1])
        # Batched MXU projection: (nh*B, S, H) x (nh*B, H, d) -> (nh*B, S, d)
        y = lax.dot_general(
            x, w_ref[...],
            dimension_numbers=(((2,), (1,)), ((0,), (0,))),
            preferred_element_type=jnp.float32)
        return y + b_ref[...]                       # bias broadcast over S

    qh = project(q_ref, wq_ref, bq_ref)             # (nh*B, S, d) f32
    kh = project(k_ref, wk_ref, bk_ref)
    vh = project(v_ref, wv_ref, bv_ref)

    # scores = q . k contracted over depth (no explicit transpose of K).
    scores = lax.dot_general(
        qh.astype(jnp.bfloat16), kh.astype(jnp.bfloat16),
        dimension_numbers=(((2,), (2,)), ((0,), (0,))),
        preferred_element_type=jnp.float32) * scale          # (nh*B, S, S)

    # Numerically-stable softmax; reciprocal of the denominator on the EUP.
    scores = scores - jnp.max(scores, axis=-1, keepdims=True)
    p = jnp.exp(scores)
    denom = jnp.sum(p, axis=-1, keepdims=True)
    probs = p * pl.reciprocal(denom, approx=True)

    # context = probs @ v  -> (nh*B, S, d)
    ctx = lax.dot_general(
        probs.astype(jnp.bfloat16), vh.astype(jnp.bfloat16),
        dimension_numbers=(((2,), (1,)), ((0,), (0,))),
        preferred_element_type=jnp.float32)

    # Output projection without a concat: contract each head's context with
    # that head's rows of W_o (pre-split in the wrapper), reduce over heads.
    proj = lax.dot_general(
        ctx.astype(jnp.bfloat16), wo_ref[...],
        dimension_numbers=(((2,), (1,)), ((0,), (0,))),
        preferred_element_type=jnp.float32)                   # (nh*B, S, 2H)
    out = jnp.sum(proj.reshape(num_heads, batch, seq, h2), axis=0)  # (B, S, 2H)
    out_ref[...] = out + bo_ref[...]


@functools.partial(jax.jit, static_argnames=("num_heads",))
def custom_multi_head_attention(q, k, v, params, *, num_heads):
    """q, k, v: [B, S, H] float32.  Returns [B, S, 2*H] float32."""
    B, S, H = q.shape
    H2 = 2 * H
    assert H2 % num_heads == 0
    depth = H2 // num_heads
    scale = float(depth) ** -0.5

    wq, bq, wk, bk, wv, bv, wo, bo = params

    def prep_in_proj(w, b):
        # [H, 2H] -> per-head [nh, H, d], replicated over batch -> [nh*B, H, d]
        w3 = jnp.transpose(w.reshape(H, num_heads, depth), (1, 0, 2))
        wb = jnp.broadcast_to(w3[:, None], (num_heads, B, H, depth))
        wb = wb.reshape(num_heads * B, H, depth).astype(jnp.bfloat16)
        b3 = jnp.broadcast_to(b.reshape(num_heads, 1, 1, depth),
                              (num_heads, B, 1, depth))
        b3 = b3.reshape(num_heads * B, 1, depth).astype(jnp.float32)
        return wb, b3

    wqb, bq3 = prep_in_proj(wq, bq)
    wkb, bk3 = prep_in_proj(wk, bk)
    wvb, bv3 = prep_in_proj(wv, bv)

    # Output projection: rows of W_o grouped per head, replicated over batch.
    wo3 = wo.reshape(num_heads, depth, H2)
    wob = jnp.broadcast_to(wo3[:, None], (num_heads, B, depth, H2))
    wob = wob.reshape(num_heads * B, depth, H2).astype(jnp.bfloat16)
    bo3 = bo.reshape(1, 1, H2).astype(jnp.float32)

    kernel = functools.partial(_mha_kernel, batch=B, seq=S,
                               num_heads=num_heads, depth=depth, scale=scale)

    vmem_spec = pl.BlockSpec(memory_space=pltpu.MemorySpace.VMEM)
    return pl.pallas_call(
        kernel,
        out_shape=jax.ShapeDtypeStruct((B, S, H2), jnp.float32),
        in_specs=[vmem_spec] * 11,
        out_specs=vmem_spec,
    )(q.astype(jnp.bfloat16), k.astype(jnp.bfloat16), v.astype(jnp.bfloat16),
      wqb, bq3, wkb, bk3, wvb, bv3, wob, bo3)


def _init_linear(key, fan_in, fan_out):
    # Deterministic init mimicking nn.Linear's uniform(-1/sqrt(fan_in), ...).
    kw, kb = jax.random.split(key)
    bound = 1.0 / (fan_in ** 0.5)
    w = jax.random.uniform(kw, (fan_in, fan_out), jnp.float32, -bound, bound)
    b = jax.random.uniform(kb, (fan_out,), jnp.float32, -bound, bound)
    return w, b


def _reference(q, k, v, params, *, num_heads):
    # Pure-JAX f32 reference mirroring the PyTorch forward exactly.
    wq, bq, wk, bk, wv, bv, wo, bo = params
    B, S, H = q.shape
    H2 = 2 * H
    depth = H2 // num_heads
    scale = float(depth) ** -0.5

    def split_heads(x):
        return x.reshape(B, S, num_heads, depth).transpose(0, 2, 1, 3)

    qp = split_heads(q @ wq + bq)
    kp = split_heads(k @ wk + bk)
    vp = split_heads(v @ wv + bv)
    scores = jnp.einsum("bhqd,bhkd->bhqk", qp, kp) * scale
    attn = jax.nn.softmax(scores, axis=-1)
    out = jnp.einsum("bhqk,bhkd->bhqd", attn, vp)
    out = out.transpose(0, 2, 1, 3).reshape(B, S, H2)
    return out @ wo + bo


if __name__ == "__main__":
    B, S, H = 2, 8, 32
    NUM_HEADS = 4
    H2 = 2 * H

    key = jax.random.PRNGKey(0)
    kq, kk, kv, k1, k2, k3, k4 = jax.random.split(key, 7)

    q = jax.random.normal(kq, (B, S, H), jnp.float32)
    k = jax.random.normal(kk, (B, S, H), jnp.float32)
    v = jax.random.normal(kv, (B, S, H), jnp.float32)

    wq, bq = _init_linear(k1, H, H2)
    wk, bk = _init_linear(k2, H, H2)
    wv, bv = _init_linear(k3, H, H2)
    wo, bo = _init_linear(k4, H2, H2)
    params = (wq, bq, wk, bk, wv, bv, wo, bo)

    out = custom_multi_head_attention(q, k, v, params, num_heads=NUM_HEADS)
    out = jax.block_until_ready(out)

    ref = _reference(q, k, v, params, num_heads=NUM_HEADS)
    assert out.shape == (B, S, H2)
    # bf16 MXU operands + approx reciprocal (per perf review) => relaxed
    # tolerance vs the pure-f32 reference.
    assert jnp.allclose(out, ref, atol=5e-2, rtol=5e-2), "mismatch vs reference"

    print("KERNEL_OK")
</pallas_src>

<mosaic_0001>
module attributes {stable_mosaic.version = 11 : i64} {
  func.func @_mha_kernel(%arg0: memref<2x8x32xbf16, #tpu.memory_space<vmem>>, %arg1: memref<2x8x32xbf16, #tpu.memory_space<vmem>>, %arg2: memref<2x8x32xbf16, #tpu.memory_space<vmem>>, %arg3: memref<8x32x16xbf16, #tpu.memory_space<vmem>>, %arg4: memref<8x1x16xf32, #tpu.memory_space<vmem>>, %arg5: memref<8x32x16xbf16, #tpu.memory_space<vmem>>, %arg6: memref<8x1x16xf32, #tpu.memory_space<vmem>>, %arg7: memref<8x32x16xbf16, #tpu.memory_space<vmem>>, %arg8: memref<8x1x16xf32, #tpu.memory_space<vmem>>, %arg9: memref<8x16x64xbf16, #tpu.memory_space<vmem>>, %arg10: memref<1x1x64xf32, #tpu.memory_space<vmem>>, %arg11: memref<2x8x64xf32, #tpu.memory_space<vmem>>) attributes {dimension_semantics = [], scalar_prefetch = 0 : i64, scratch_operands = 0 : i64, tpu.core_type = #tpu.core_type<tc>} {
    %c0 = arith.constant 0 : index
    %c0_0 = arith.constant 0 : index
    %c0_1 = arith.constant 0 : index
    %0 = vector.load %arg0[%c0, %c0_0, %c0_1] : memref<2x8x32xbf16, #tpu.memory_space<vmem>>, vector<2x8x32xbf16>
    %1 = vector.shape_cast %0 : vector<2x8x32xbf16> to vector<1x2x8x32xbf16>
    %2 = vector.shape_cast %1 : vector<1x2x8x32xbf16> to vector<1x2x8x32xbf16>
    %3 = vector.broadcast %2 : vector<1x2x8x32xbf16> to vector<4x2x8x32xbf16>
    %4 = vector.shape_cast %3 : vector<4x2x8x32xbf16> to vector<8x8x32xbf16>
    %c0_2 = arith.constant 0 : index
    %c0_3 = arith.constant 0 : index
    %c0_4 = arith.constant 0 : index
    %5 = vector.load %arg3[%c0_2, %c0_3, %c0_4] : memref<8x32x16xbf16, #tpu.memory_space<vmem>>, vector<8x32x16xbf16>
    %cst = arith.constant dense<0.000000e+00> : vector<8x8x16xf32>
    %6 = tpu.matmul %4, %5, %cst {dimension_numbers = #tpu.dot_dimension_numbers<[2], [1], [1], [2], [0, 0, 0, 1, 1, 2], [0], [0]>} : vector<8x8x32xbf16>, vector<8x32x16xbf16>, vector<8x8x16xf32> -> vector<8x8x16xf32>
    %c0_5 = arith.constant 0 : index
    %c0_6 = arith.constant 0 : index
    %c0_7 = arith.constant 0 : index
    %7 = vector.load %arg4[%c0_5, %c0_6, %c0_7] : memref<8x1x16xf32, #tpu.memory_space<vmem>>, vector<8x1x16xf32>
    %8 = vector.broadcast %7 : vector<8x1x16xf32> to vector<8x8x16xf32>
    %9 = arith.addf %6, %8 : vector<8x8x16xf32>
    %c0_8 = arith.constant 0 : index
    %c0_9 = arith.constant 0 : index
    %c0_10 = arith.constant 0 : index
    %10 = vector.load %arg1[%c0_8, %c0_9, %c0_10] : memref<2x8x32xbf16, #tpu.memory_space<vmem>>, vector<2x8x32xbf16>
    %11 = vector.shape_cast %10 : vector<2x8x32xbf16> to vector<1x2x8x32xbf16>
    %12 = vector.shape_cast %11 : vector<1x2x8x32xbf16> to vector<1x2x8x32xbf16>
    %13 = vector.broadcast %12 : vector<1x2x8x32xbf16> to vector<4x2x8x32xbf16>
    %14 = vector.shape_cast %13 : vector<4x2x8x32xbf16> to vector<8x8x32xbf16>
    %c0_11 = arith.constant 0 : index
    %c0_12 = arith.constant 0 : index
    %c0_13 = arith.constant 0 : index
    %15 = vector.load %arg5[%c0_11, %c0_12, %c0_13] : memref<8x32x16xbf16, #tpu.memory_space<vmem>>, vector<8x32x16xbf16>
    %cst_14 = arith.constant dense<0.000000e+00> : vector<8x8x16xf32>
    %16 = tpu.matmul %14, %15, %cst_14 {dimension_numbers = #tpu.dot_dimension_numbers<[2], [1], [1], [2], [0, 0, 0, 1, 1, 2], [0], [0]>} : vector<8x8x32xbf16>, vector<8x32x16xbf16>, vector<8x8x16xf32> -> vector<8x8x16xf32>
    %c0_15 = arith.constant 0 : index
    %c0_16 = arith.constant 0 : index
    %c0_17 = arith.constant 0 : index
    %17 = vector.load %arg6[%c0_15, %c0_16, %c0_17] : memref<8x1x16xf32, #tpu.memory_space<vmem>>, vector<8x1x16xf32>
    %18 = vector.broadcast %17 : vector<8x1x16xf32> to vector<8x8x16xf32>
    %19 = arith.addf %16, %18 : vector<8x8x16xf32>
    %c0_18 = arith.constant 0 : index
    %c0_19 = arith.constant 0 : index
    %c0_20 = arith.constant 0 : index
    %20 = vector.load %arg2[%c0_18, %c0_19, %c0_20] : memref<2x8x32xbf16, #tpu.memory_space<vmem>>, vector<2x8x32xbf16>
    %21 = vector.shape_cast %20 : vector<2x8x32xbf16> to vector<1x2x8x32xbf16>
    %22 = vector.shape_cast %21 : vector<1x2x8x32xbf16> to vector<1x2x8x32xbf16>
    %23 = vector.broadcast %22 : vector<1x2x8x32xbf16> to vector<4x2x8x32xbf16>
    %24 = vector.shape_cast %23 : vector<4x2x8x32xbf16> to vector<8x8x32xbf16>
    %c0_21 = arith.constant 0 : index
    %c0_22 = arith.constant 0 : index
    %c0_23 = arith.constant 0 : index
    %25 = vector.load %arg7[%c0_21, %c0_22, %c0_23] : memref<8x32x16xbf16, #tpu.memory_space<vmem>>, vector<8x32x16xbf16>
    %cst_24 = arith.constant dense<0.000000e+00> : vector<8x8x16xf32>
    %26 = tpu.matmul %24, %25, %cst_24 {dimension_numbers = #tpu.dot_dimension_numbers<[2], [1], [1], [2], [0, 0, 0, 1, 1, 2], [0], [0]>} : vector<8x8x32xbf16>, vector<8x32x16xbf16>, vector<8x8x16xf32> -> vector<8x8x16xf32>
    %c0_25 = arith.constant 0 : index
    %c0_26 = arith.constant 0 : index
    %c0_27 = arith.constant 0 : index
    %27 = vector.load %arg8[%c0_25, %c0_26, %c0_27] : memref<8x1x16xf32, #tpu.memory_space<vmem>>, vector<8x1x16xf32>
    %28 = vector.broadcast %27 : vector<8x1x16xf32> to vector<8x8x16xf32>
    %29 = arith.addf %26, %28 : vector<8x8x16xf32>
    %30 = arith.truncf %9 : vector<8x8x16xf32> to vector<8x8x16xbf16>
    %31 = arith.truncf %19 : vector<8x8x16xf32> to vector<8x8x16xbf16>
    %cst_28 = arith.constant dense<0.000000e+00> : vector<8x8x8xf32>
    %32 = tpu.matmul %30, %31, %cst_28 {dimension_numbers = #tpu.dot_dimension_numbers<[2], [2], [1], [1], [0, 0, 0, 1, 1, 1], [0], [0]>} : vector<8x8x16xbf16>, vector<8x8x16xbf16>, vector<8x8x8xf32> -> vector<8x8x8xf32>
    %cst_29 = arith.constant 2.500000e-01 : f32
    %33 = vector.broadcast %cst_29 : f32 to vector<8x8x8xf32>
    %34 = arith.mulf %32, %33 : vector<8x8x8xf32>
    %cst_30 = arith.constant dense<0xFF800000> : vector<8x8xf32>
    %35 = vector.multi_reduction <maximumf>, %34, %cst_30 [2] : vector<8x8x8xf32> to vector<8x8xf32>
    %36 = vector.shape_cast %35 : vector<8x8xf32> to vector<8x8x1xf32>
    %37 = vector.broadcast %36 : vector<8x8x1xf32> to vector<8x8x8xf32>
    %38 = arith.subf %34, %37 : vector<8x8x8xf32>
    %39 = math.exp %38 : vector<8x8x8xf32>
    %cst_31 = arith.constant dense<0.000000e+00> : vector<8x8xf32>
    %40 = vector.multi_reduction <add>, %39, %cst_31 [2] : vector<8x8x8xf32> to vector<8x8xf32>
    %41 = vector.shape_cast %40 : vector<8x8xf32> to vector<8x8x1xf32>
    %42 = tpu.reciprocal %41 {approx = true} : vector<8x8x1xf32> -> vector<8x8x1xf32>
    %43 = vector.broadcast %42 : vector<8x8x1xf32> to vector<8x8x8xf32>
    %44 = arith.mulf %39, %43 : vector<8x8x8xf32>
    %45 = arith.truncf %44 : vector<8x8x8xf32> to vector<8x8x8xbf16>
    %46 = arith.truncf %29 : vector<8x8x16xf32> to vector<8x8x16xbf16>
    %cst_32 = arith.constant dense<0.000000e+00> : vector<8x8x16xf32>
    %47 = tpu.matmul %45, %46, %cst_32 {dimension_numbers = #tpu.dot_dimension_numbers<[2], [1], [1], [2], [0, 0, 0, 1, 1, 2], [0], [0]>} : vector<8x8x8xbf16>, vector<8x8x16xbf16>, vector<8x8x16xf32> -> vector<8x8x16xf32>
    %48 = arith.truncf %47 : vector<8x8x16xf32> to vector<8x8x16xbf16>
    %c0_33 = arith.constant 0 : index
    %c0_34 = arith.constant 0 : index
    %c0_35 = arith.constant 0 : index
    %49 = vector.load %arg9[%c0_33, %c0_34, %c0_35] : memref<8x16x64xbf16, #tpu.memory_space<vmem>>, vector<8x16x64xbf16>
    %cst_36 = arith.constant dense<0.000000e+00> : vector<8x8x64xf32>
    %50 = tpu.matmul %48, %49, %cst_36 {dimension_numbers = #tpu.dot_dimension_numbers<[2], [1], [1], [2], [0, 0, 0, 1, 1, 2], [0], [0]>} : vector<8x8x16xbf16>, vector<8x16x64xbf16>, vector<8x8x64xf32> -> vector<8x8x64xf32>
    %51 = vector.shape_cast %50 : vector<8x8x64xf32> to vector<4x2x8x64xf32>
    %cst_37 = arith.constant dense<0.000000e+00> : vector<2x8x64xf32>
    %52 = vector.multi_reduction <add>, %51, %cst_37 [0] : vector<4x2x8x64xf32> to vector<2x8x64xf32>
    %c0_38 = arith.constant 0 : index
    %c0_39 = arith.constant 0 : index
    %c0_40 = arith.constant 0 : index
    %53 = vector.load %arg10[%c0_38, %c0_39, %c0_40] : memref<1x1x64xf32, #tpu.memory_space<vmem>>, vector<1x1x64xf32>
    %54 = vector.broadcast %53 : vector<1x1x64xf32> to vector<2x8x64xf32>
    %55 = arith.addf %52, %54 : vector<2x8x64xf32>
    %c0_41 = arith.constant 0 : index
    %c0_42 = arith.constant 0 : index
    %c0_43 = arith.constant 0 : index
    %56 = vector.load %arg11[%c0_41, %c0_42, %c0_43] : memref<2x8x64xf32, #tpu.memory_space<vmem>>, vector<2x8x64xf32>
    tpu.vector_store %arg11[%c0_41, %c0_42, %c0_43], %55 {strides = array<i32>} : memref<2x8x64xf32, #tpu.memory_space<vmem>>, vector<2x8x64xf32>,
    return
  }
}

</mosaic_0001>

<bundles_post_ra>
// kernel: custom_multi_head_attention.1
= control target key start
LH: loop header
LB: loop body
LE: loop exit
PB: predicated region body
PF: predicated region fallthrough
CT: control target
= control target key end

     0   :  { %vm118_vm0 = vcmask 261120   ;;  %s2376_s0 = inlined_call_operand.vmem [shape: bf16[2,8,32], index: 0, kind: input, shape index: {}]   ;;  %s2377_s1 = inlined_call_operand.vmem [shape: bf16[2,8,32], index: 1, kind: input, shape index: {}]   ;;  %s2378_s2 = inlined_call_operand.vmem [shape: bf16[2,8,32], index: 2, kind: input, shape index: {}]   ;;  %s2379_s3 = inlined_call_operand.vmem [shape: bf16[8,32,16], index: 3, kind: input, shape index: {}]   ;;  %s2380_s4 = inlined_call_operand.vmem [shape: f32[8,1,16], index: 4, kind: input, shape index: {}]   ;;  %s2381_s5 = inlined_call_operand.vmem [shape: bf16[8,32,16], index: 5, kind: input, shape index: {}]   ;;  %s2382_s6 = inlined_call_operand.vmem [shape: f32[8,1,16], index: 6, kind: input, shape index: {}]   ;;  %s2383_s7 = inlined_call_operand.vmem [shape: bf16[8,32,16], index: 7, kind: input, shape index: {}]   ;;  %s2384_s8 = inlined_call_operand.vmem [shape: f32[8,1,16], index: 8, kind: input, shape index: {}]   ;;  %s2385_s9 = inlined_call_operand.vmem [shape: bf16[8,16,64], index: 9, kind: input, shape index: {}]   ;;  %s2386_s10 = inlined_call_operand.vmem [shape: f32[1,1,64], index: 10, kind: input, shape index: {}]   ;;  %s2387_s11 = inlined_call_operand.hbm [shape: f32[2,8,64], index: 11, kind: output, shape index: {}]  }
   0x1   :  { %v1806_v0 = vld [vmem:[%s2379_s3 + $0x8] sm:$0xff]  ;;  %v1808_v1 = vld [vmem:[%s2379_s3 + $0x18] sm:$0xff]  ;;  %v1805_v4 = vld [vmem:[%s2379_s3] sm:$0xff] }
   0x2   :  { %v1810_v2 = vld [vmem:[%s2379_s3 + $0x28] sm:$0xff]  ;;  %v1812_v3 = vld [vmem:[%s2379_s3 + $0x38] sm:$0xff]  ;;  %128 = vmatpush.bf16.msra.mxu0 %v1806_v0  ;;  %156 = vmatpush.bf16.msra.mxu1 %v1808_v1  ;;  %v1807_v5 = vld [vmem:[%s2379_s3 + $0x10] sm:$0xff] }
   0x3   :  { %181 = vmatpush.bf16.msra.mxu2 %v1810_v2  ;;  %206 = vmatpush.bf16.msra.mxu3 %v1812_v3  ;;  %v1809_v6 = vld [vmem:[%s2379_s3 + $0x20] sm:$0xff]  ;;  %v1811_v7 = vld [vmem:[%s2379_s3 + $0x30] sm:$0xff]  ;;  %v1814_v8 = vld [vmem:[%s2379_s3 + $0x48] sm:$0xff] }
   0x4   :  { %v1816_v9 = vld [vmem:[%s2379_s3 + $0x58] sm:$0xff]  ;;  %v40_v10 = vld [vmem:[%s2376_s0] sm:$0xf]  ;;  %v41_v11 = vld [vmem:[%s2376_s0 + $0x4] sm:$0xf] }
   0x5   :  { %v1818_v12 = vld [vmem:[%s2379_s3 + $0x68] sm:$0xff]  ;;  %v1820_v13 = vld [vmem:[%s2379_s3 + $0x78] sm:$0xff]  ;;  %v1813_v14 = vld [vmem:[%s2379_s3 + $0x40] sm:$0xff] }
   0x6   :  { %129 = vmatpush.bf16.msra.mxu0 %v1805_v4  ;;  %157 = vmatpush.bf16.msra.mxu1 %v1807_v5  ;;  %v1815_v15 = vld [vmem:[%s2379_s3 + $0x50] sm:$0xff]  ;;  %v1822_v16 = vld [vmem:[%s2381_s5 + $0x8] sm:$0xff]  ;;  %v1824_v17 = vld [vmem:[%s2381_s5 + $0x18] sm:$0xff] }
   0x7   :  { %182 = vmatpush.bf16.msra.mxu2 %v1809_v6  ;;  %207 = vmatpush.bf16.msra.mxu3 %v1811_v7  ;;  %v1817_v18 = vld [vmem:[%s2379_s3 + $0x60] sm:$0xff]  ;;  %v1819_v19 = vld [vmem:[%s2379_s3 + $0x70] sm:$0xff]  ;;  %v1826_v20 = vld [vmem:[%s2381_s5 + $0x28] sm:$0xff] }
   0x8   :  { %v1828_v21 = vld [vmem:[%s2381_s5 + $0x38] sm:$0xff]  ;;  %v1821_v22 = vld [vmem:[%s2381_s5] sm:$0xff]  ;;  %v1823_v23 = vld [vmem:[%s2381_s5 + $0x10] sm:$0xff] }
   0x9   :  { %1541 = vmatmul.msk.bf16.vlgmr.msra.gmra.mxu0 %vm118_vm0, %v40_v10  ;;  %1550 = vmatmul.msk.bf16.vlgmr.msra.gmra.mxu1 %vm118_vm0, %v41_v11  ;;  %v1825_v24 = vld [vmem:[%s2381_s5 + $0x20] sm:$0xff]  ;;  %v1827_v25 = vld [vmem:[%s2381_s5 + $0x30] sm:$0xff] }
   0xa   :  { %231 = vmatpush.bf16.msrb.mxu0 %v1814_v8  ;;  %256 = vmatpush.bf16.msrb.mxu1 %v1816_v9 }
   0xb   :  { %1559 = vmatmul.msk.bf16.vlgmr.msra.gmra.mxu2 %vm118_vm0, %v40_v10  ;;  %1568 = vmatmul.msk.bf16.vlgmr.msra.gmra.mxu3 %vm118_vm0, %v41_v11 }
   0xc   :  { %281 = vmatpush.bf16.msrb.mxu2 %v1818_v12  ;;  %306 = vmatpush.bf16.msrb.mxu3 %v1820_v13 }
   0xe   :  { %232 = vmatpush.bf16.msrb.mxu0 %v1813_v14  ;;  %257 = vmatpush.bf16.msrb.mxu1 %v1815_v15 }
  0x10   :  { %282 = vmatpush.bf16.msrb.mxu2 %v1817_v18  ;;  %307 = vmatpush.bf16.msrb.mxu3 %v1819_v19 }
  0x12   :  { %400 = vmatpush.bf16.msra.mxu0 %v1822_v16  ;;  %428 = vmatpush.bf16.msra.mxu1 %v1824_v17 }
  0x14   :  { %453 = vmatpush.bf16.msra.mxu2 %v1826_v20  ;;  %478 = vmatpush.bf16.msra.mxu3 %v1828_v21 }
  0x16   :  { %401 = vmatpush.bf16.msra.mxu0 %v1821_v22  ;;  %429 = vmatpush.bf16.msra.mxu1 %v1823_v23 }
  0x18   :  { %454 = vmatpush.bf16.msra.mxu2 %v1825_v24  ;;  %479 = vmatpush.bf16.msra.mxu3 %v1827_v25 }
  0x19   :  { %16 = vsyncpa [#allocation3], 0  ;;  %v1830_v26 = vld [vmem:[%s2381_s5 + $0x48] sm:$0xff]  ;;  %v1832_v27 = vld [vmem:[%s2381_s5 + $0x58] sm:$0xff]  ;;  %1577 = vmatmul.msk.bf16.vlgmr.msrb.gmra.mxu0 %vm118_vm0, %v40_v10  ;;  %1586 = vmatmul.msk.bf16.vlgmr.msrb.gmra.mxu1 %vm118_vm0, %v41_v11  ;;  %vm873_vm1 = vcmask 130048   ;;  %vm1142_vm2 = vcmask 1043456  }
  0x1a   :  { %v1834_v28 = vld [vmem:[%s2381_s5 + $0x68] sm:$0xff]  ;;  %v1836_v29 = vld [vmem:[%s2381_s5 + $0x78] sm:$0xff]  ;;  %503 = vmatpush.bf16.msrb.mxu0 %v1830_v26  ;;  %528 = vmatpush.bf16.msrb.mxu1 %v1832_v27  ;;  %v1829_v30 = vld [vmem:[%s2381_s5 + $0x40] sm:$0xff]  ;;  %vm1034_vm3 = vcmask 64512   ;;  %vm1492_vm4 = vcmask 523264   ;;  %s1947_s26 = smov [#allocation2]  }
  0x1b   :  { %1595 = vmatmul.msk.bf16.vlgmr.msrb.gmra.mxu2 %vm118_vm0, %v40_v10  ;;  %1604 = vmatmul.msk.bf16.vlgmr.msrb.gmra.mxu3 %vm118_vm0, %v41_v11  ;;  %v1831_v31 = vld [vmem:[%s2381_s5 + $0x50] sm:$0xff]  ;;  %v1833_v32 = vld [vmem:[%s2381_s5 + $0x60] sm:$0xff]  ;;  %v1842_v36 = vld [vmem:[%s2383_s7 + $0x28] sm:$0xff]  ;;  %s1948_s28 = smov 128  }
  0x1c   :  { %553 = vmatpush.bf16.msrb.mxu2 %v1834_v28  ;;  %578 = vmatpush.bf16.msrb.mxu3 %v1836_v29  ;;  %v1835_v33 = vld [vmem:[%s2381_s5 + $0x70] sm:$0xff]  ;;  %v313_v34 = vld [vmem:[%s2377_s1] sm:$0xf]  ;;  %v314_v35 = vld [vmem:[%s2377_s1 + $0x4] sm:$0xf]  ;;  %s1521_s5 = sshll.u32 %s2387_s11, 4  ;;  %s1522_s5 = int_to_ptr.hbm [resolvable:$true] %s1521_s5 }
  0x1d   :  { %v1838_v37 = vld [vmem:[%s2383_s7 + $0x8] sm:$0xff]  ;;  %v1840_v38 = vld [vmem:[%s2383_s7 + $0x18] sm:$0xff]  ;;  %v1841_v39 = vld [vmem:[%s2383_s7 + $0x20] sm:$0xff]  ;;  %s1949_s1 = smov 8  }
  0x1e   :  { %504 = vmatpush.bf16.msrb.mxu0 %v1829_v30  ;;  %529 = vmatpush.bf16.msrb.mxu1 %v1831_v31  ;;  %v1837_v40 = vld [vmem:[%s2383_s7] sm:$0xff]  ;;  %v1839_v41 = vld [vmem:[%s2383_s7 + $0x10] sm:$0xff]  ;;  %v1844_v42 = vld [vmem:[%s2383_s7 + $0x38] sm:$0xff] }
  0x1f   :  { %v585_v43 = vld [vmem:[%s2378_s2] sm:$0xf]  ;;  %v586_v44 = vld [vmem:[%s2378_s2 + $0x4] sm:$0xf]  ;;  %v1843_v45 = vld [vmem:[%s2383_s7 + $0x30] sm:$0xff] }
  0x20   :  { %554 = vmatpush.bf16.msrb.mxu2 %v1833_v32  ;;  %579 = vmatpush.bf16.msrb.mxu3 %v1835_v33  ;;  %v1850_v46 = vld [vmem:[%s2383_s7 + $0x68] sm:$0xff]  ;;  %v1848_v48 = vld [vmem:[%s2383_s7 + $0x58] sm:$0xff]  ;;  %v1849_v49 = vld [vmem:[%s2383_s7 + $0x60] sm:$0xff] }
  0x21   :  { %v1846_v47 = vld [vmem:[%s2383_s7 + $0x48] sm:$0xff]  ;;  %v1845_v50 = vld [vmem:[%s2383_s7 + $0x40] sm:$0xff]  ;;  %v1847_v51 = vld [vmem:[%s2383_s7 + $0x50] sm:$0xff] }
  0x22   :  { %v1852_v52 = vld [vmem:[%s2383_s7 + $0x78] sm:$0xff]  ;;  %v1851_v53 = vld [vmem:[%s2383_s7 + $0x70] sm:$0xff]  ;;  %v1872_v4 = vld [vmem:[%s2382_s6] ss:$0 sm:$0xff] }
  0x23   :  { %v1873_v5 = vld [vmem:[%s2382_s6 + $0x1] ss:$0 sm:$0xff]  ;;  %v1864_v12 = vld [vmem:[%s2380_s4] ss:$0 sm:$0xff]  ;;  %v1874_v16 = vld [vmem:[%s2382_s6 + $0x2] ss:$0 sm:$0xff] }
  0x24   :  { %v1865_v15 = vld [vmem:[%s2380_s4 + $0x1] ss:$0 sm:$0xff]  ;;  %v1875_v17 = vld [vmem:[%s2382_s6 + $0x3] ss:$0 sm:$0xff]  ;;  %v1866_v28 = vld [vmem:[%s2380_s4 + $0x2] ss:$0 sm:$0xff] }
  0x25   :  { %v1867_v29 = vld [vmem:[%s2380_s4 + $0x3] ss:$0 sm:$0xff] }
  0x29   :  { %1613 = vmatmul.msk.bf16.vlgmr.msra.gmra.mxu0 %vm118_vm0, %v313_v34  ;;  %1622 = vmatmul.msk.bf16.vlgmr.msra.gmra.mxu1 %vm118_vm0, %v314_v35 }
  0x2a   :  { %672 = vmatpush.bf16.msra.mxu0 %v1838_v37  ;;  %700 = vmatpush.bf16.msra.mxu1 %v1840_v38  ;;  %v1877_v37 = vld [vmem:[%s2382_s6 + $0x5] ss:$0 sm:$0xff] }
  0x2b   :  { %1631 = vmatmul.msk.bf16.vlgmr.msra.gmra.mxu2 %vm118_vm0, %v313_v34  ;;  %1640 = vmatmul.msk.bf16.vlgmr.msra.gmra.mxu3 %vm118_vm0, %v314_v35 }
  0x2c   :  { %725 = vmatpush.bf16.msra.mxu2 %v1842_v36  ;;  %750 = vmatpush.bf16.msra.mxu3 %v1844_v42  ;;  %v1876_v36 = vld [vmem:[%s2382_s6 + $0x4] ss:$0 sm:$0xff] }
  0x2e   :  { %673 = vmatpush.bf16.msra.mxu0 %v1837_v40  ;;  %701 = vmatpush.bf16.msra.mxu1 %v1839_v41 }
  0x30   :  { %726 = vmatpush.bf16.msra.mxu2 %v1841_v39  ;;  %751 = vmatpush.bf16.msra.mxu3 %v1843_v45 }
  0x39   :  { %1649 = vmatmul.msk.bf16.vlgmr.msrb.gmra.mxu0 %vm118_vm0, %v313_v34  ;;  %1658 = vmatmul.msk.bf16.vlgmr.msrb.gmra.mxu1 %vm118_vm0, %v314_v35 }
  0x3a   :  { %775 = vmatpush.bf16.msrb.mxu0 %v1846_v47  ;;  %800 = vmatpush.bf16.msrb.mxu1 %v1848_v48  ;;  %v1868_v48 = vld [vmem:[%s2380_s4 + $0x4] ss:$0 sm:$0xff] }
  0x3b   :  { %1667 = vmatmul.msk.bf16.vlgmr.msrb.gmra.mxu2 %vm118_vm0, %v313_v34  ;;  %1676 = vmatmul.msk.bf16.vlgmr.msrb.gmra.mxu3 %vm118_vm0, %v314_v35 }
  0x3c   :  { %825 = vmatpush.bf16.msrb.mxu2 %v1850_v46  ;;  %850 = vmatpush.bf16.msrb.mxu3 %v1852_v52  ;;  %v1878_v52 = vld [vmem:[%s2382_s6 + $0x6] ss:$0 sm:$0xff] }
  0x3e   :  { %776 = vmatpush.bf16.msrb.mxu0 %v1845_v50  ;;  %801 = vmatpush.bf16.msrb.mxu1 %v1847_v51  ;;  %v1869_v51 = vld [vmem:[%s2380_s4 + $0x5] ss:$0 sm:$0xff] }
  0x40   :  { %826 = vmatpush.bf16.msrb.mxu2 %v1849_v49  ;;  %851 = vmatpush.bf16.msrb.mxu3 %v1851_v53  ;;  %v1879_v53 = vld [vmem:[%s2382_s6 + $0x7] ss:$0 sm:$0xff] }
  0x49   :  { %1685 = vmatmul.msk.bf16.vlgmr.msra.gmra.mxu0 %vm118_vm0, %v585_v43  ;;  %1694 = vmatmul.msk.bf16.vlgmr.msra.gmra.mxu1 %vm118_vm0, %v586_v44 }
  0x4b   :  { %1703 = vmatmul.msk.bf16.vlgmr.msra.gmra.mxu2 %vm118_vm0, %v585_v43  ;;  %1712 = vmatmul.msk.bf16.vlgmr.msra.gmra.mxu3 %vm118_vm0, %v586_v44 }
  0x59   :  { %1721 = vmatmul.msk.bf16.vlgmr.msrb.gmra.mxu0 %vm118_vm0, %v585_v43  ;;  %1730 = vmatmul.msk.bf16.vlgmr.msrb.gmra.mxu1 %vm118_vm0, %v586_v44 }
  0x5b   :  { %1739 = vmatmul.msk.bf16.vlgmr.msrb.gmra.mxu2 %vm118_vm0, %v585_v43  ;;  %1748 = vmatmul.msk.bf16.vlgmr.msrb.gmra.mxu3 %vm118_vm0, %v586_v44 }
  0x86   :  { %v131_v54 = vpop.f32.mrf.mxu0  ;;  %v159_v55 = vpop.f32.mrf.mxu1 }
  0x87   :  { %v132_v22 = vadd.f32 %v1864_v12, %v131_v54  ;;  %v160_v23 = vadd.f32 %v1865_v15, %v159_v55 }
  0x89   :  { %v857_v32 = vpack.c.bf16 %v132_v22, %v132_v22  ;;  %v858_v33 = vpack.c.bf16 %v160_v23, %v160_v23 }
  0x8e   :  { %v184_v56 = vpop.f32.mrf.mxu2  ;;  %v209_v57 = vpop.f32.mrf.mxu3 }
  0x8f   :  { %v133_v58 = vpop.f32.mrf.mxu0  ;;  %v161_v59 = vpop.f32.mrf.mxu1  ;;  %v185_v38 = vadd.f32 %v1866_v28, %v184_v56  ;;  %v210_v39 = vadd.f32 %v1867_v29, %v209_v57 }
  0x91   :  { %v859_v46 = vpack.c.bf16 %v185_v38, %v185_v38  ;;  %v860_v47 = vpack.c.bf16 %v210_v39, %v210_v39 }
  0x96   :  { %v186_v60 = vpop.f32.mrf.mxu2  ;;  %v211_v61 = vpop.f32.mrf.mxu3 }
  0x97   :  { %v2196_v62 = vpop.f32.mrf.mxu0  ;;  %v2198_v63 = vpop.f32.mrf.mxu1 }
  0x98   :  { %v235_v58 = vadd.f32 %v1868_v48, %v2196_v62  ;;  %v260_v59 = vadd.f32 %v1869_v51, %v2198_v63 }
  0x9e   :  { %v2200_v0 = vpop.f32.mrf.mxu2  ;;  %v2202_v1 = vpop.f32.mrf.mxu3 }
  0x9f   :  { %v236_v2 = vpop.f32.mrf.mxu0  ;;  %v261_v3 = vpop.f32.mrf.mxu1 }
  0xa6   :  { %v286_v6 = vpop.f32.mrf.mxu2  ;;  %v311_v7 = vpop.f32.mrf.mxu3 }
  0xa7   :  { %v403_v8 = vpop.f32.mrf.mxu0  ;;  %v431_v9 = vpop.f32.mrf.mxu1 }
  0xa8   :  { %v404_v10 = vadd.f32 %v1872_v4, %v403_v8  ;;  %v432_v11 = vadd.f32 %v1873_v5, %v431_v9  ;;  %v1870_v4 = vld [vmem:[%s2380_s4 + $0x6] ss:$0 sm:$0xff]  ;;  %v1871_v5 = vld [vmem:[%s2380_s4 + $0x7] ss:$0 sm:$0xff]  ;;  %v861_v8 = vpack.c.bf16 %v235_v58, %v235_v58  ;;  %v862_v9 = vpack.c.bf16 %v260_v59, %v260_v59 }
  0xaa   :  { %v865_v13 = vpack.c.bf16 %v404_v10, %v404_v10  ;;  %v866_v14 = vpack.c.bf16 %v432_v11, %v432_v11  ;;  %v285_v10 = vadd.f32 %v1870_v4, %v2200_v0  ;;  %v310_v11 = vadd.f32 %v1871_v5, %v2202_v1  ;;  %v1881_v0 = vld [vmem:[%s2384_s8 + $0x1] ss:$0 sm:$0xff] }
  0xac   :  { %v878_v18 = vsel %vm873_vm1, %v865_v13, 0  ;;  %v897_v19 = vsel %vm873_vm1, %v866_v14, 0  ;;  %v863_v14 = vpack.c.bf16 %v285_v10, %v285_v10  ;;  %v864_v15 = vpack.c.bf16 %v310_v11, %v310_v11 }
  0xad   :  { %887 = vmatpush.bf16.xpose.msra.mxu0 %v878_v18  ;;  %906 = vmatpush.bf16.xpose.msra.mxu1 %v897_v19 }
  0xae   :  { %v456_v20 = vpop.f32.mrf.mxu2  ;;  %v481_v21 = vpop.f32.mrf.mxu3 }
  0xaf   :  { %v457_v24 = vadd.f32 %v1874_v16, %v456_v20  ;;  %v482_v25 = vadd.f32 %v1875_v17, %v481_v21  ;;  %v405_v26 = vpop.f32.mrf.mxu0  ;;  %v433_v27 = vpop.f32.mrf.mxu1  ;;  %v1880_v16 = vld [vmem:[%s2384_s8] ss:$0 sm:$0xff]  ;;  %v1882_v20 = vld [vmem:[%s2384_s8 + $0x2] ss:$0 sm:$0xff] }
  0xb1   :  { %v867_v30 = vpack.c.bf16 %v457_v24, %v457_v24  ;;  %v868_v31 = vpack.c.bf16 %v482_v25, %v482_v25 }
  0xb3   :  { %v916_v34 = vsel %vm873_vm1, %v867_v30, 0  ;;  %v935_v35 = vsel %vm873_vm1, %v868_v31, 0  ;;  %v1883_v31 = vld [vmem:[%s2384_s8 + $0x3] ss:$0 sm:$0xff] }
  0xb4   :  { %925 = vmatpush.bf16.xpose.msra.mxu2 %v916_v34  ;;  %944 = vmatpush.bf16.xpose.msra.mxu3 %v935_v35  ;;  %v1884_v35 = vld [vmem:[%s2384_s8 + $0x4] ss:$0 sm:$0xff] }
  0xb5   :  { %1749 = vmatmul.msk.bf16.vlgmr.msra.gmra.mxu0 %vm873_vm1, %v857_v32  ;;  %1750 = vmatmul.msk.bf16.vlgmr.msra.gmra.mxu1 %vm873_vm1, %v858_v33 }
  0xb6   :  { %v458_v40 = vpop.f32.mrf.mxu2  ;;  %v483_v41 = vpop.f32.mrf.mxu3 }
  0xb7   :  { %v506_v42 = vpop.f32.mrf.mxu0  ;;  %v531_v43 = vpop.f32.mrf.mxu1 }
  0xb8   :  { %v507_v44 = vadd.f32 %v1876_v36, %v506_v42  ;;  %v532_v45 = vadd.f32 %v1877_v37, %v531_v43  ;;  %v1885_v36 = vld [vmem:[%s2384_s8 + $0x5] ss:$0 sm:$0xff]  ;;  %v1886_v43 = vld [vmem:[%s2384_s8 + $0x6] ss:$0 sm:$0xff] }
  0xba   :  { %v869_v49 = vpack.c.bf16 %v507_v44, %v507_v44  ;;  %v870_v50 = vpack.c.bf16 %v532_v45, %v532_v45 }
  0xbb   :  { %1751 = vmatmul.msk.bf16.vlgmr.msra.gmra.mxu2 %vm873_vm1, %v859_v46  ;;  %1752 = vmatmul.msk.bf16.vlgmr.msra.gmra.mxu3 %vm873_vm1, %v860_v47 }
  0xbc   :  { %v954_v54 = vsel %vm873_vm1, %v869_v49, 0  ;;  %v973_v55 = vsel %vm873_vm1, %v870_v50, 0 }
  0xbd   :  { %963 = vmatpush.bf16.xpose.msrb.mxu0 %v954_v54  ;;  %982 = vmatpush.bf16.xpose.msrb.mxu1 %v973_v55  ;;  %v1887_v55 = vld [vmem:[%s2384_s8 + $0x7] ss:$0 sm:$0xff] }
  0xbe   :  { %v556_v56 = vpop.f32.mrf.mxu2  ;;  %v581_v57 = vpop.f32.mrf.mxu3 }
  0xbf   :  { %v557_v60 = vadd.f32 %v1878_v52, %v556_v56  ;;  %v582_v61 = vadd.f32 %v1879_v53, %v581_v57  ;;  %v508_v2 = vpop.f32.mrf.mxu0  ;;  %v533_v3 = vpop.f32.mrf.mxu1 }
  0xc1   :  { %v871_v6 = vpack.c.bf16 %v557_v60, %v557_v60  ;;  %v872_v7 = vpack.c.bf16 %v582_v61, %v582_v61 }
  0xc3   :  { %v992_v62 = vsel %vm873_vm1, %v871_v6, 0  ;;  %v1011_v63 = vsel %vm873_vm1, %v872_v7, 0 }
  0xc4   :  { %1001 = vmatpush.bf16.xpose.msrb.mxu2 %v992_v62  ;;  %1020 = vmatpush.bf16.xpose.msrb.mxu3 %v1011_v63 }
  0xc5   :  { %1753 = vmatmul.msk.bf16.vlgmr.msrb.gmra.mxu0 %vm873_vm1, %v861_v8  ;;  %1754 = vmatmul.msk.bf16.vlgmr.msrb.gmra.mxu1 %vm873_vm1, %v862_v9 }
  0xc6   :  { %v558_v12 = vpop.f32.mrf.mxu2  ;;  %v583_v13 = vpop.f32.mrf.mxu3 }
  0xc7   :  { %v675_v1 = vpop.f32.mrf.mxu0  ;;  %v703_v17 = vpop.f32.mrf.mxu1 }
  0xc8   :  { %v676_v18 = vadd.f32 %v1880_v16, %v675_v1  ;;  %v704_v19 = vadd.f32 %v1881_v0, %v703_v17 }
  0xca   :  { %v1131_v21 = vpack.c.bf16 %v676_v18, %v676_v18  ;;  %v1132_v22 = vpack.c.bf16 %v704_v19, %v704_v19 }
  0xcb   :  { %1755 = vmatmul.msk.bf16.vlgmr.msrb.gmra.mxu2 %vm873_vm1, %v863_v14  ;;  %1756 = vmatmul.msk.bf16.vlgmr.msrb.gmra.mxu3 %vm873_vm1, %v864_v15 }
  0xcc   :  { %v1144_v24 = vsel %vm1142_vm2, %v1131_v21, 0  ;;  %v1163_v25 = vsel %vm1142_vm2, %v1132_v22, 0 }
  0xcd   :  { %1153 = vmatpush.bf16.msra.mxu0 %v1144_v24  ;;  %1172 = vmatpush.bf16.msra.mxu1 %v1163_v25 }
  0xce   :  { %v728_v23 = vpop.f32.mrf.mxu2  ;;  %v753_v32 = vpop.f32.mrf.mxu3 }
  0xcf   :  { %v729_v26 = vadd.f32 %v1882_v20, %v728_v23  ;;  %v677_v28 = vpop.f32.mrf.mxu0  ;;  %v705_v29 = vpop.f32.mrf.mxu1  ;;  %v754_v34 = vadd.f32 %v1883_v31, %v753_v32 }
  0xd1   :  { %v1133_v27 = vpack.c.bf16 %v729_v26, %v729_v26  ;;  %v1134_v37 = vpack.c.bf16 %v754_v34, %v754_v34 }
  0xd3   :  { %v1182_v30 = vsel %vm1142_vm2, %v1133_v27, 0  ;;  %v1201_v40 = vsel %vm1142_vm2, %v1134_v37, 0 }
  0xd4   :  { %1191 = vmatpush.bf16.msra.mxu2 %v1182_v30  ;;  %1210 = vmatpush.bf16.msra.mxu3 %v1201_v40 }
  0xd6   :  { %v730_v33 = vpop.f32.mrf.mxu2  ;;  %v755_v46 = vpop.f32.mrf.mxu3 }
  0xd7   :  { %v778_v38 = vpop.f32.mrf.mxu0  ;;  %v803_v39 = vpop.f32.mrf.mxu1 }
  0xd8   :  { %v779_v41 = vadd.f32 %v1884_v35, %v778_v38  ;;  %v804_v42 = vadd.f32 %v1885_v36, %v803_v39 }
  0xda   :  { %v1135_v44 = vpack.c.bf16 %v779_v41, %v779_v41  ;;  %v1136_v45 = vpack.c.bf16 %v804_v42, %v804_v42 }
  0xdc   :  { %v1220_v48 = vsel %vm1142_vm2, %v1135_v44, 0  ;;  %v1239_v49 = vsel %vm1142_vm2, %v1136_v45, 0 }
  0xdd   :  { %1229 = vmatpush.bf16.msrb.mxu0 %v1220_v48  ;;  %1248 = vmatpush.bf16.msrb.mxu1 %v1239_v49 }
  0xde   :  { %v828_v47 = vpop.f32.mrf.mxu2  ;;  %v853_v56 = vpop.f32.mrf.mxu3 }
  0xdf   :  { %v829_v50 = vadd.f32 %v1886_v43, %v828_v47  ;;  %v780_v52 = vpop.f32.mrf.mxu0  ;;  %v805_v53 = vpop.f32.mrf.mxu1  ;;  %v854_v58 = vadd.f32 %v1887_v55, %v853_v56 }
  0xe1   :  { %v1137_v51 = vpack.c.bf16 %v829_v50, %v829_v50  ;;  %v1138_v59 = vpack.c.bf16 %v854_v58, %v854_v58 }
  0xe3   :  { %v1258_v54 = vsel %vm1142_vm2, %v1137_v51, 0  ;;  %v1277_v60 = vsel %vm1142_vm2, %v1138_v59, 0 }
  0xe4   :  { %1267 = vmatpush.bf16.msrb.mxu2 %v1258_v54  ;;  %1286 = vmatpush.bf16.msrb.mxu3 %v1277_v60 }
  0xe6   :  { %v830_v57 = vpop.f32.mrf.mxu2  ;;  %v855_v61 = vpop.f32.mrf.mxu3 }
 0x132   :  { %v889_v2 = vpop.f32.mrf.mxu0  ;;  %v908_v3 = vpop.f32.mrf.mxu1 }
 0x133   :  { %v1026_v4 = vmul.f32 0.25, %v889_v2  ;;  %v1027_v6 = vmul.f32 0.25, %v908_v3 }
 0x135   :  { %v1035_v5 = vsel %vm1034_vm3, %v1026_v4, -inf  ;;  %v1038_v9 = vsel %vm1034_vm3, %v1027_v6, -inf }
 0x136   :  { %1036 = vmax.xlane.f32.xlu1 %v1035_v5 }
 0x13a   :  { %v891_v7 = vpop.f32.mrf.mxu0  ;;  %v910_v8 = vpop.f32.mrf.mxu1 }
 0x13e   :  { %v927_v62 = vpop.f32.mrf.mxu2  ;;  %v946_v63 = vpop.f32.mrf.mxu3  ;;  %1039 = vmax.xlane.f32.xlu1 %v1038_v9 }
 0x13f   :  { %v1028_v10 = vmul.f32 0.25, %v927_v62  ;;  %v1029_v15 = vmul.f32 0.25, %v946_v63 }
 0x141   :  { %v1041_v11 = vsel %vm1034_vm3, %v1028_v10, -inf  ;;  %v1044_v17 = vsel %vm1034_vm3, %v1029_v15, -inf }
 0x142   :  { %v984_v12 = vpop.f32.mrf.mxu1  ;;  %1042 = vmax.xlane.f32.xlu0 %v1041_v11  ;;  %v965_v13 = vpop.f32.mrf.mxu0 }
 0x143   :  { %v1031_v14 = vmul.f32 0.25, %v984_v12  ;;  %v1030_v20 = vmul.f32 0.25, %v965_v13 }
 0x145   :  { %v1050_v16 = vsel %vm1034_vm3, %v1031_v14, -inf  ;;  %v1047_v25 = vsel %vm1034_vm3, %v1030_v20, -inf }
 0x146   :  { %v929_v0 = vpop.f32.mrf.mxu2  ;;  %v948_v1 = vpop.f32.mrf.mxu3  ;;  %1051 = vmax.xlane.f32.xlu1 %v1050_v16 }
 0x14a   :  { %v986_v18 = vpop.f32.mrf.mxu1  ;;  %1045 = vmax.xlane.f32.xlu0 %v1044_v17  ;;  %v967_v19 = vpop.f32.mrf.mxu0 }
 0x14e   :  { %v1003_v21 = vpop.f32.mrf.mxu2  ;;  %v1022_v22 = vpop.f32.mrf.mxu3 }
 0x14f   :  { %v1032_v23 = vmul.f32 0.25, %v1003_v21  ;;  %v1033_v26 = vmul.f32 0.25, %v1022_v22 }
 0x151   :  { %v1053_v24 = vsel %vm1034_vm3, %v1032_v23, -inf  ;;  %v1056_v29 = vsel %vm1034_vm3, %v1033_v26, -inf }
 0x152   :  { %1054 = vmax.xlane.f32.xlu2 %v1053_v24  ;;  %1048 = vmax.xlane.f32.xlu0 %v1047_v25 }
 0x156   :  { %v1005_v27 = vpop.f32.mrf.mxu2  ;;  %v1024_v28 = vpop.f32.mrf.mxu3 }
 0x15a   :  { %1057 = vmax.xlane.f32.xlu2 %v1056_v29 }
 0x1a9   :  { %v1037_v30 = vpop.xlane.xlu1 %1036 }
 0x1aa   :  { %v1059_v31 = vsub.f32 %v1026_v4, %v1037_v30 }
 0x1ac   :  { %v1067_v32 = vmul.f32 1.442695, %v1059_v31 }
 0x1ae   :  { %1889 = vpow2.f32 %v1067_v32 }
 0x1b1   :  { %v1040_v34 = vpop.xlane.xlu1 %1039 }
 0x1b2   :  { %v1060_v38 = vsub.f32 %v1027_v6, %v1040_v34 }
 0x1b4   :  { %v1890_v33 = vpop.eup %1889  ;;  %v1069_v40 = vmul.f32 1.442695, %v1060_v38  ;;  %v1853_v38 = vld [vmem:[%s2385_s9] sm:$0xff] }
 0x1b5   :  { %v1043_v35 = vpop.xlane.xlu0 %1042  ;;  %v1083_v36 = vsel %vm1034_vm3, %v1890_v33, 0.0 }
 0x1b6   :  { %v1061_v37 = vsub.f32 %v1028_v10, %v1043_v35  ;;  %1084 = vadd.xlane.f32.xlu1 %v1083_v36 }
 0x1b8   :  { %v1071_v39 = vmul.f32 1.442695, %v1061_v37 }
 0x1b9   :  { %v1052_v46 = vpop.xlane.xlu1 %1051 }
 0x1ba   :  { %1891 = vpow2.f32 %v1071_v39  ;;  %v1064_v53 = vsub.f32 %v1031_v14, %v1052_v46  ;;  %v1855_v39 = vld [vmem:[%s2385_s9 + $0x10] sm:$0xff]  ;;  %v1858_v46 = vld [vmem:[%s2385_s9 + $0x28] sm:$0xff] }
 0x1bb   :  { %1893 = vpow2.f32 %v1069_v40  ;;  %v1854_v40 = vld [vmem:[%s2385_s9 + $0x8] sm:$0xff] }
 0x1bc   :  { %v1077_v58 = vmul.f32 1.442695, %v1064_v53 }
 0x1bd   :  { %v1046_v41 = vpop.xlane.xlu0 %1045 }
 0x1be   :  { %v1062_v42 = vsub.f32 %v1029_v15, %v1046_v41  ;;  %v1856_v41 = vld [vmem:[%s2385_s9 + $0x18] sm:$0xff] }
 0x1c0   :  { %v1892_v43 = vpop.eup %1891  ;;  %v1073_v44 = vmul.f32 1.442695, %v1062_v42  ;;  %v1857_v42 = vld [vmem:[%s2385_s9 + $0x20] sm:$0xff] }
 0x1c1   :  { %v1089_v45 = vsel %vm1034_vm3, %v1892_v43, 0.0  ;;  %v1894_v49 = vpop.eup %1893 }
 0x1c2   :  { %1895 = vpow2.f32 %v1073_v44  ;;  %1090 = vadd.xlane.f32.xlu2 %v1089_v45  ;;  %v1086_v56 = vsel %vm1034_vm3, %v1894_v49, 0.0  ;;  %v1859_v45 = vld [vmem:[%s2385_s9 + $0x30] sm:$0xff] }
 0x1c5   :  { %v1055_v47 = vpop.xlane.xlu2 %1054  ;;  %v1049_v48 = vpop.xlane.xlu0 %1048 }
 0x1c6   :  { %v1065_v50 = vsub.f32 %v1032_v23, %v1055_v47  ;;  %v1063_v51 = vsub.f32 %v1030_v20, %v1049_v48  ;;  %v1860_v47 = vld [vmem:[%s2385_s9 + $0x38] sm:$0xff] }
 0x1c8   :  { %v1896_v52 = vpop.eup %1895  ;;  %v1079_v54 = vmul.f32 1.442695, %v1065_v50  ;;  %v1075_v55 = vmul.f32 1.442695, %v1063_v51 }
 0x1c9   :  { %v1092_v57 = vsel %vm1034_vm3, %v1896_v52, 0.0 }
 0x1ca   :  { %1897 = vpow2.f32 %v1079_v54  ;;  %1087 = vadd.xlane.f32.xlu2 %v1086_v56  ;;  %1093 = vadd.xlane.f32.xlu0 %v1092_v57 }
 0x1cb   :  { %1899 = vpow2.f32 %v1075_v55 }
 0x1cc   :  { %1901 = vpow2.f32 %v1077_v58 }
 0x1cd   :  { %v1058_v59 = vpop.xlane.xlu2 %1057 }
 0x1ce   :  { %v1066_v60 = vsub.f32 %v1033_v26, %v1058_v59 }
 0x1d0   :  { %v1898_v61 = vpop.eup %1897  ;;  %v1081_v2 = vmul.f32 1.442695, %v1066_v60 }
 0x1d1   :  { %v1900_v3 = vpop.eup %1899  ;;  %v1101_v4 = vsel %vm1034_vm3, %v1898_v61, 0.0 }
 0x1d2   :  { %1903 = vpow2.f32 %v1081_v2  ;;  %1102 = vadd.xlane.f32.xlu0 %v1101_v4  ;;  %v1095_v5 = vsel %vm1034_vm3, %v1900_v3, 0.0  ;;  %v1902_v6 = vpop.eup %1901 }
 0x1d3   :  { %1096 = vadd.xlane.f32.xlu2 %v1095_v5  ;;  %v1098_v9 = vsel %vm1034_vm3, %v1902_v6, 0.0 }
 0x1d8   :  { %v1904_v7 = vpop.eup %1903 }
 0x1d9   :  { %v1104_v8 = vsel %vm1034_vm3, %v1904_v7, 0.0 }
 0x1da   :  { %1105 = vadd.xlane.f32.xlu1 %v1104_v8  ;;  %1099 = vadd.xlane.f32.xlu0 %v1098_v9 }
 0x229   :  { %v1085_v62 = vpop.xlane.xlu1 %1084 }
 0x22a   :  { %1905 = vrcp.f32 %v1085_v62 }
 0x230   :  { %v1906_v63 = vpop.eup %1905 }
 0x231   :  { %v1115_v10 = vmul.f32 %v1906_v63, %v1890_v33 }
 0x233   :  { %v1123_v11 = vpack.c.bf16 %v1115_v10, %v1115_v10 }
 0x235   :  { %v1091_v12 = vpop.xlane.xlu2 %1090  ;;  %1757 = vmatmul.msk.bf16.vlgmr.msra.gmra.mxu0 %vm1034_vm3, %v1123_v11 }
 0x236   :  { %1907 = vrcp.f32 %v1091_v12  ;;  %1332 = vmatpush.bf16.msra.mxu0 %v1853_v38 }
 0x23c   :  { %v1908_v13 = vpop.eup %1907 }
 0x23d   :  { %v1117_v14 = vmul.f32 %v1908_v13, %v1892_v43  ;;  %v1088_v15 = vpop.xlane.xlu2 %1087  ;;  %v1094_v16 = vpop.xlane.xlu0 %1093 }
 0x23e   :  { %1909 = vrcp.f32 %v1088_v15 }
 0x23f   :  { %v1125_v0 = vpack.c.bf16 %v1117_v14, %v1117_v14  ;;  %1911 = vrcp.f32 %v1094_v16 }
 0x241   :  { %1759 = vmatmul.msk.bf16.vlgmr.msra.gmra.mxu2 %vm1034_vm3, %v1125_v0 }
 0x242   :  { %1376 = vmatpush.bf16.msra.mxu2 %v1855_v39 }
 0x244   :  { %v1910_v1 = vpop.eup %1909 }
 0x245   :  { %v1912_v17 = vpop.eup %1911  ;;  %v1116_v18 = vmul.f32 %v1910_v1, %v1894_v49  ;;  %v1103_v19 = vpop.xlane.xlu0 %1102 }
 0x246   :  { %v1118_v20 = vmul.f32 %v1912_v17, %v1896_v52  ;;  %v1097_v21 = vpop.xlane.xlu2 %1096  ;;  %1913 = vrcp.f32 %v1103_v19 }
 0x247   :  { %v1124_v22 = vpack.c.bf16 %v1116_v18, %v1116_v18  ;;  %1915 = vrcp.f32 %v1097_v21 }
 0x248   :  { %v1126_v23 = vpack.c.bf16 %v1118_v20, %v1118_v20 }
 0x249   :  { %1758 = vmatmul.msk.bf16.vlgmr.msra.gmra.mxu1 %vm1034_vm3, %v1124_v22  ;;  %v1888_v22 = vld [vmem:[%s2386_s10] ss:$0 sm:$0xff]  ;;  %s1519_s10 = sshll.u32 %s1947_s26, 4  ;;  %s1520_s10 = int_to_ptr.vmem [resolvable:$true] %s1519_s10 }
 0x24a   :  { %1760 = vmatmul.msk.bf16.vlgmr.msra.gmra.mxu3 %vm1034_vm3, %v1126_v23  ;;  %1354 = vmatpush.bf16.msra.mxu1 %v1854_v40 }
 0x24b   :  { %1398 = vmatpush.bf16.msra.mxu3 %v1856_v41 }
 0x24c   :  { %v1914_v24 = vpop.eup %1913 }
 0x24d   :  { %v1916_v25 = vpop.eup %1915  ;;  %v1121_v26 = vmul.f32 %v1914_v24, %v1898_v61  ;;  %v1106_v27 = vpop.xlane.xlu1 %1105 }
 0x24e   :  { %v1100_v28 = vpop.xlane.xlu0 %1099  ;;  %v1119_v29 = vmul.f32 %v1916_v25, %v1900_v3  ;;  %1917 = vrcp.f32 %v1106_v27 }
 0x24f   :  { %v1129_v30 = vpack.c.bf16 %v1121_v26, %v1121_v26  ;;  %1919 = vrcp.f32 %v1100_v28 }
 0x250   :  { %v1127_v31 = vpack.c.bf16 %v1119_v29, %v1119_v29 }
 0x251   :  { %1763 = vmatmul.msk.bf16.vlgmr.msrb.gmra.mxu2 %vm1034_vm3, %v1129_v30 }
 0x252   :  { %1761 = vmatmul.msk.bf16.vlgmr.msrb.gmra.mxu0 %vm1034_vm3, %v1127_v31  ;;  %1464 = vmatpush.bf16.msrb.mxu2 %v1859_v45 }
 0x253   :  { %1420 = vmatpush.bf16.msrb.mxu0 %v1857_v42 }
 0x254   :  { %v1918_v32 = vpop.eup %1917 }
 0x255   :  { %v1920_v33 = vpop.eup %1919  ;;  %v1122_v34 = vmul.f32 %v1918_v32, %v1904_v7 }
 0x256   :  { %v1120_v35 = vmul.f32 %v1920_v33, %v1902_v6 }
 0x257   :  { %v1130_v36 = vpack.c.bf16 %v1122_v34, %v1122_v34 }
 0x258   :  { %v1128_v37 = vpack.c.bf16 %v1120_v35, %v1120_v35 }
 0x25a   :  { %1762 = vmatmul.msk.bf16.vlgmr.msrb.gmra.mxu1 %vm1034_vm3, %v1128_v37  ;;  %1764 = vmatmul.msk.bf16.vlgmr.msrb.gmra.mxu3 %vm1034_vm3, %v1130_v36 }
 0x25b   :  { %1442 = vmatpush.bf16.msrb.mxu1 %v1858_v46  ;;  %1486 = vmatpush.bf16.msrb.mxu3 %v1860_v47 }
 0x2b2   :  { %v1155_v43 = vpop.f32.mrf.mxu0 }
 0x2b3   :  { %v1292_v44 = vpack.c.bf16 %v1155_v43, %v1155_v43 }
 0x2b5   :  { %1769 = vmatmul.msk.bf16.vlgmr.msra.gmra.mxu0 %vm873_vm1, %v1292_v44 }
 0x2ba   :  { %v1157_v48 = vpop.f32.mrf.mxu0 }
 0x2c4   :  { %v1193_v49 = vpop.f32.mrf.mxu2 }
 0x2c5   :  { %v1294_v50 = vpack.c.bf16 %v1193_v49, %v1193_v49 }
 0x2c6   :  { %v1174_v51 = vpop.f32.mrf.mxu1 }
 0x2c7   :  { %v1293_v52 = vpack.c.bf16 %v1174_v51, %v1174_v51  ;;  %1779 = vmatmul.msk.bf16.vlgmr.msra.gmra.mxu2 %vm873_vm1, %v1294_v50 }
 0x2c9   :  { %1774 = vmatmul.msk.bf16.vlgmr.msra.gmra.mxu1 %vm873_vm1, %v1293_v52 }
 0x2cc   :  { %v1195_v53 = vpop.f32.mrf.mxu2 }
 0x2cd   :  { %v1212_v54 = vpop.f32.mrf.mxu3 }
 0x2ce   :  { %v1295_v55 = vpack.c.bf16 %v1212_v54, %v1212_v54  ;;  %v1176_v56 = vpop.f32.mrf.mxu1 }
 0x2cf   :  { %v1231_v57 = vpop.f32.mrf.mxu0 }
 0x2d0   :  { %v1296_v58 = vpack.c.bf16 %v1231_v57, %v1231_v57  ;;  %1784 = vmatmul.msk.bf16.vlgmr.msra.gmra.mxu3 %vm873_vm1, %v1295_v55 }
 0x2d2   :  { %1789 = vmatmul.msk.bf16.vlgmr.msrb.gmra.mxu0 %vm873_vm1, %v1296_v58 }
 0x2d4   :  { %v1269_v59 = vpop.f32.mrf.mxu2 }
 0x2d5   :  { %v1214_v60 = vpop.f32.mrf.mxu3  ;;  %v1298_v61 = vpack.c.bf16 %v1269_v59, %v1269_v59 }
 0x2d7   :  { %v1233_v2 = vpop.f32.mrf.mxu0  ;;  %v1250_v3 = vpop.f32.mrf.mxu1  ;;  %1799 = vmatmul.msk.bf16.vlgmr.msrb.gmra.mxu2 %vm873_vm1, %v1298_v61 }
 0x2d8   :  { %v1297_v4 = vpack.c.bf16 %v1250_v3, %v1250_v3 }
 0x2da   :  { %1794 = vmatmul.msk.bf16.vlgmr.msrb.gmra.mxu1 %vm873_vm1, %v1297_v4 }
 0x2dc   :  { %v1271_v5 = vpop.f32.mrf.mxu2 }
 0x2dd   :  { %v1288_v6 = vpop.f32.mrf.mxu3 }
 0x2de   :  { %v1299_v7 = vpack.c.bf16 %v1288_v6, %v1288_v6 }
 0x2df   :  { %v1252_v8 = vpop.f32.mrf.mxu1 }
 0x2e0   :  { %1804 = vmatmul.msk.bf16.vlgmr.msrb.gmra.mxu3 %vm873_vm1, %v1299_v7 }
 0x2e5   :  { %v1290_v9 = vpop.f32.mrf.mxu3 }
 0x332   :  { %v1334_v62 = vpop.f32.mrf.mxu0 }
 0x333   :  { %v1493_v0 = vsel %vm1492_vm4, %v1334_v62, 0.0 }
 0x33a   :  { %v1336_v63 = vpop.f32.mrf.mxu0 }
 0x346   :  { %v1356_v10 = vpop.f32.mrf.mxu1 }
 0x347   :  { %v1500_v29 = vsel %vm1492_vm4, %v1356_v10, 0.0 }
 0x34a   :  { %v1378_v11 = vpop.f32.mrf.mxu2 }
 0x34b   :  { %v1494_v16 = vsel %vm1492_vm4, %v1378_v11, 0.0 }
 0x34c   :  { %v1495_v19 = vadd.f32 %v1494_v16, %v1493_v0 }
 0x34e   :  { %v1358_v12 = vpop.f32.mrf.mxu1 }
 0x34f   :  { %v1422_v13 = vpop.f32.mrf.mxu0 }
 0x350   :  { %v1496_v1 = vsel %vm1492_vm4, %v1422_v13, 0.0 }
 0x351   :  { %v1497_v20 = vadd.f32 %v1496_v1, %v1495_v19 }
 0x352   :  { %v1380_v14 = vpop.f32.mrf.mxu2 }
 0x353   :  { %v1400_v15 = vpop.f32.mrf.mxu3 }
 0x354   :  { %v1501_v26 = vsel %vm1492_vm4, %v1400_v15, 0.0 }
 0x355   :  { %v1502_v31 = vadd.f32 %v1501_v26, %v1500_v29 }
 0x357   :  { %v1424_v17 = vpop.f32.mrf.mxu0  ;;  %v1444_v18 = vpop.f32.mrf.mxu1 }
 0x358   :  { %v1503_v30 = vsel %vm1492_vm4, %v1444_v18, 0.0 }
 0x359   :  { %v1504_v33 = vadd.f32 %v1503_v30, %v1502_v31 }
 0x35a   :  { %v1466_v21 = vpop.f32.mrf.mxu2 }
 0x35b   :  { %v1402_v23 = vpop.f32.mrf.mxu3  ;;  %v1498_v24 = vsel %vm1492_vm4, %v1466_v21, 0.0 }
 0x35c   :  { %v1499_v25 = vadd.f32 %v1498_v24, %v1497_v20 }
 0x35e   :  { %v1511_v27 = vadd.f32 %v1888_v22, %v1499_v25 }
 0x35f   :  { %v1446_v28 = vpop.f32.mrf.mxu1 }
 0x360   :  { %1513 = vst.msk [vmem:[#allocation2] sm:$0xff] %vm1492_vm4, %v1511_v27 }
 0x362   :  { %v1468_v32 = vpop.f32.mrf.mxu2 }
 0x363   :  { %v1488_v34 = vpop.f32.mrf.mxu3 }
 0x364   :  { %v1505_v35 = vsel %vm1492_vm4, %v1488_v34, 0.0 }
 0x365   :  { %v1506_v36 = vadd.f32 %v1505_v35, %v1504_v33 }
 0x367   :  { %v1512_v37 = vadd.f32 %v1888_v22, %v1506_v36 }
 0x369   :  { %1514 = vst.msk [vmem:[#allocation2 + $0x8] sm:$0xff] %vm1492_vm4, %v1512_v37 }
 0x36a   :  { %1527 = dma.vmem_to_hbm [thread:$0]  %s1520_s10, 256, %s1522_s5, [#allocation3], %s1948_s28, %s1948_s28, %s1949_s1  }
 0x36b   :  { %v1490_v38 = vpop.f32.mrf.mxu3 }
 0x36c   :  { %1945 = dma.done.wait [#allocation3], 256  }
 0x36d   :  { %1946 = vsyncadd [#allocation3], 4294967040 }
 0x36e   :  { %1532 = vsyncpa [#allocation3], 1 }

</bundles_post_ra>
